<compile_context>
chip_gen: v5e
topology: v5e:2x2
jax: 0.10.0
libtpu: 0.0.40
codegen_flags: <defaults>
</compile_context>

<pallas_src>
import math
from functools import partial

import jax
import jax.numpy as jnp
from jax import lax
from jax.experimental import pallas as pl
from jax.experimental.pallas import tpu as pltpu

_LANE = 128        # vreg lane width: output / MXU-N minor dim padded to this
_MXU_DEPTH = 128   # contraction depth at/above which per-tap dots feed the MXU well


def _round_up(x, m):
    return -(-x // m) * m


def _divisors(n):
    return [d for d in range(n, 0, -1) if n % d == 0]


def _vmem_capacity_bytes():
    try:
        info = pltpu.get_tpu_info()
        cap = getattr(info, "vmem_capacity_bytes", None)
        if cap:
            return int(cap)
    except Exception:
        pass
    return 64 * 1024 * 1024   # conservative fallback (v7x per-core VMEM)


# ----------------------------------------------------------------------------- kernels
def _fds_kernel_slab(x_ref, w_ref, b_ref, o_ref, slab_ref, *, offsets, C4, Mo):
    """Small-C4 path: persistent im2col slab + one fused T-deep MXU contraction.

    Grid = (N, row-tiles, Cout-tiles), Cout innermost: the slab (and the x phase
    tile it is built from) is built once per x tile and reused for every Cout
    tile.  x_ref: (1,1,C4,Mp) bf16; w_ref: (tCout,T) bf16; o_ref: (1,1,tCout,Mo).
    """
    @pl.when(pl.program_id(2) == 0)
    def _build_slab():
        x = x_ref[0, 0]                                   # (C4, Mp)
        for idx, off in enumerate(offsets):               # static unroll, 1 store per tap group
            slab_ref[idx * C4:(idx + 1) * C4, :] = x[:, off:off + Mo]

    acc = jnp.dot(w_ref[...], slab_ref[...], preferred_element_type=jnp.float32)
    o_ref[0, 0] = (acc + b_ref[...]).astype(o_ref.dtype)


def _fds_kernel_direct(x_ref, w_ref, b_ref, o_ref, *, offsets, C4, Mo):
    """Large-C4 path: no slab; one accumulated MXU dot per (dh, dw) tap group,
    each of depth 4*Cin, straight off lane-shifted views of the phase tile."""
    x = x_ref[0, 0]                                       # (C4, Mp) bf16
    w = w_ref[...]                                        # (tCout, T) bf16
    acc = jnp.dot(w[:, 0:C4], x[:, offsets[0]:offsets[0] + Mo],
                  preferred_element_type=jnp.float32)
    for idx in range(1, len(offsets)):
        off = offsets[idx]
        acc = acc + jnp.dot(w[:, idx * C4:(idx + 1) * C4], x[:, off:off + Mo],
                            preferred_element_type=jnp.float32)
    o_ref[0, 0] = (acc + b_ref[...]).astype(o_ref.dtype)


# ----------------------------------------------------------------------------- wrapper
def fused_downsample(x_nchw, weight, bias, multiplier, *, pad,
                     max_cout_tile=None, max_rows_tile=None):
    """Pallas implementation of FusedDownsample.forward.  x_nchw: (N,Cin,H,W) f32."""
    Cout, Cin, k, _ = weight.shape
    N, _, H, W = x_nchw.shape
    K = k + 1                      # fused kernel size
    Keff = K + (K % 2)             # rounded up to even (extra taps are zero)
    D = Keff // 2 - 1              # per-phase halo
    C4 = 4 * Cin
    T = Keff * Keff * Cin

    Ho = (H + 2 * pad - K) // 2 + 1
    Wo = (W + 2 * pad - K) // 2 + 1
    PWs = Wo + D                   # phase width (D slack cols absorb the dw shifts)
    Cout_p = _round_up(Cout, 8)    # robust tCout even for awkward / prime Cout

    direct = C4 >= _MXU_DEPTH

    # ---- generation-aware VMEM budget ---------------------------------------
    vmem_cap = _vmem_capacity_bytes()                       # 64 MiB v7x, 128 MiB v5e/v6e
    tile_budget = min(vmem_cap // 6, 24 * 1024 * 1024)
    vmem_limit = int(min(vmem_cap * 5 // 8, 96 * 1024 * 1024))

    def geom(t_ho):
        m = t_ho * PWs
        m_pad = _round_up(m, _LANE)                         # lane-dense output / MXU-N dim
        pht = -(-(D * (PWs + 1) + m_pad) // PWs)            # rows incl. halo + lane slack
        return m, m_pad, pht, pht * PWs

    def vmem_est(t_ho, t_co):
        m, m_pad, pht, mp = geom(t_ho)
        est = (2 * C4 * mp * 2                              # x phase tile, bf16, dbl-buffered
               + 2 * t_co * T * 2                           # weight tile, bf16, dbl-buffered
               + 2 * t_co * m_pad * 4                       # output tile, f32, dbl-buffered
               + 2 * t_co * m_pad * 4                       # f32 accumulator + temporaries
               + C4 * m_pad * 2)                            # lane-shifted slice temporary
        if not direct:
            est += T * m_pad * 2                            # persistent im2col slab scratch
        return est

    # ---- tile selection -------------------------------------------------------
    cout_cands = [d for d in _divisors(Cout_p) if d % 8 == 0 or d == Cout_p]
    if max_cout_tile is not None:
        cout_cands = [d for d in cout_cands if d <= max_cout_tile] or [cout_cands[-1]]
    cout_cands = [d for d in cout_cands if d <= 256] or [cout_cands[-1]]

    ho_cands = _divisors(Ho)
    if max_rows_tile is not None:
        ho_cands = [d for d in ho_cands if d <= max_rows_tile] or [ho_cands[-1]]

    tCout, fits = None, None
    for tc in cout_cands:
        f = [d for d in ho_cands if vmem_est(d, tc) <= tile_budget]
        if f:
            tCout, fits = tc, f
            break
    if tCout is None:                                       # pathological: smallest tiles
        tCout, fits = cout_cands[-1], [ho_cands[-1]]

    nCo = Cout_p // tCout
    if N * nCo == 1:
        # v7x has 2 TensorCores: make sure the all-parallel grid has >= 2 steps.
        multi = [d for d in fits if Ho // d >= 2]
        tHo = multi[0] if multi else fits[0]
    else:
        tHo = fits[0]
    nT = Ho // tHo

    M, M_pad, PHt, Mp = geom(tHo)

    # ---- weight fusion + reorder (tiny, plain JAX) ----------------------------
    wp = jnp.pad(weight * multiplier, ((0, 0), (0, 0), (1, 1), (1, 1)))
    wf = (wp[:, :, 1:, 1:] + wp[:, :, :-1, 1:]
          + wp[:, :, 1:, :-1] + wp[:, :, :-1, :-1]) / 4.0    # (Cout, Cin, K, K)
    if Keff != K:
        wf = jnp.pad(wf, ((0, 0), (0, 0), (0, Keff - K), (0, Keff - K)))
    if Cout_p != Cout:
        wf = jnp.pad(wf, ((0, Cout_p - Cout), (0, 0), (0, 0), (0, 0)))
        bias_f = jnp.pad(bias, (0, Cout_p - Cout))
    else:
        bias_f = bias
    # kh = 2*dh + a, kw = 2*dw + b -> order (co, (dh, dw, a, b, ci)) so taps fuse
    # against the phase-ordered im2col slab / shifted views.
    w6 = wf.reshape(Cout_p, Cin, Keff // 2, 2, Keff // 2, 2)
    w6 = jnp.transpose(w6, (0, 2, 4, 3, 5, 1))               # (co, dh, dw, a, b, ci)
    w2 = w6.reshape(Cout_p, T).astype(jnp.bfloat16)
    b2 = bias_f.reshape(Cout_p, 1).astype(jnp.float32)

    # ---- input prep: one pad + one gather/transpose builds the bf16 phase
    # tensor (N, nT, 4*Cin, PHt*PWs); fuses under jit.
    Hp_t = 2 * (Ho - tHo) + 2 * PHt
    Wp_t = 2 * PWs
    xb = x_nchw.astype(jnp.bfloat16)
    xp = jnp.pad(xb, ((0, 0), (0, 0),
                      (pad, max(0, Hp_t - H - pad)),
                      (pad, max(0, Wp_t - W - pad))))[:, :, :Hp_t, :Wp_t]
    row_idx = 2 * tHo * jnp.arange(nT)[:, None] + jnp.arange(2 * PHt)[None, :]
    xg = xp[:, :, row_idx, :]                                # (N, Cin, nT, 2*PHt, 2*PWs)
    xg = xg.reshape(N, Cin, nT, PHt, 2, PWs, 2)
    ph = jnp.transpose(xg, (0, 2, 4, 6, 1, 3, 5))            # (N, nT, a, b, Cin, PHt, PWs)
    ph = ph.reshape(N, nT, C4, Mp)

    offsets = tuple(dh * PWs + dw
                    for dh in range(Keff // 2) for dw in range(Keff // 2))

    if direct:
        kernel = partial(_fds_kernel_direct, offsets=offsets, C4=C4, Mo=M_pad)
        scratch = []
    else:
        kernel = partial(_fds_kernel_slab, offsets=offsets, C4=C4, Mo=M_pad)
        scratch = [pltpu.VMEM((T, M_pad), jnp.bfloat16)]

    cost = pl.CostEstimate(
        flops=2 * N * Cout * Ho * Wo * Cin * K * K,
        transcendentals=0,
        bytes_accessed=int(ph.size * 2 + w2.size * 2 + b2.size * 4
                           + N * nT * Cout_p * M_pad * 4))

    # Grid: (batch, row-tiles, Cout-tiles) with Cout innermost -> x tile stays
    # VMEM-resident across all Cout tiles; only the small weight block streams.
    res = pl.pallas_call(
        kernel,
        out_shape=jax.ShapeDtypeStruct((N, nT, Cout_p, M_pad), jnp.float32),
        grid_spec=pltpu.PrefetchScalarGridSpec(
            num_scalar_prefetch=0,
            grid=(N, nT, nCo),
            in_specs=[
                pl.BlockSpec((1, 1, C4, Mp), lambda n, r, c: (n, r, 0, 0)),
                pl.BlockSpec((tCout, T), lambda n, r, c: (c, 0)),
                pl.BlockSpec((tCout, 1), lambda n, r, c: (c, 0)),
            ],
            out_specs=pl.BlockSpec((1, 1, tCout, M_pad), lambda n, r, c: (n, r, c, 0)),
            scratch_shapes=scratch),
        compiler_params=pltpu.CompilerParams(
            dimension_semantics=("parallel", "parallel", "arbitrary"),
            vmem_limit_bytes=vmem_limit),
        cost_estimate=cost,
    )(ph, w2, b2)

    # Strip padded channels + lane slack, fold row tiles back -> (N, Cout, Ho, Wo).
    res = res[:, :, :Cout, :M]
    res = res.reshape(N, nT, Cout, tHo, PWs)[..., :Wo]
    out = jnp.transpose(res, (0, 2, 1, 3, 4)).reshape(N, Cout, Ho, Wo)
    return out


def fused_downsample_ref(x_nchw, weight, bias, multiplier, pad):
    """Pure-JAX f32 reference matching the PyTorch forward (for verification)."""
    wp = jnp.pad(weight * multiplier, ((0, 0), (0, 0), (1, 1), (1, 1)))
    wf = (wp[:, :, 1:, 1:] + wp[:, :, :-1, 1:]
          + wp[:, :, 1:, :-1] + wp[:, :, :-1, :-1]) / 4.0
    out = lax.conv_general_dilated(
        x_nchw, wf, window_strides=(2, 2),
        padding=[(pad, pad), (pad, pad)],
        dimension_numbers=('NCHW', 'OIHW', 'NCHW'),
        precision=lax.Precision.HIGHEST)
    return out + bias[None, :, None, None]


if __name__ == "__main__":
    key = jax.random.PRNGKey(0)

    configs = [
        # primary spec-sized case
        dict(N=2, Cin=4, Cout=8, H=16, W=16, k=3, pad=1),
        # pad=0 (odd Ho, exercises the forced >=2 row-tile split for N=1)
        dict(N=1, Cin=4, Cout=8, H=16, W=16, k=3, pad=0),
        # even kernel, odd spatial, Cout needing channel padding
        dict(N=1, Cin=3, Cout=6, H=15, W=15, k=4, pad=2),
        # multi Cout-tile + multi row-tile (slab reuse across Cout tiles)
        dict(N=1, Cin=4, Cout=16, H=32, W=32, k=3, pad=1,
             max_cout_tile=8, max_rows_tile=8),
        # large 4*Cin -> direct accumulated-dot MXU path (no slab scratch)
        dict(N=1, Cin=32, Cout=8, H=16, W=16, k=3, pad=1),
    ]

    fds = jax.jit(fused_downsample,
                  static_argnames=("pad", "max_cout_tile", "max_rows_tile"))

    for i, cfg in enumerate(configs):
        key, kw, kx = jax.random.split(key, 3)
        N, Cin, Cout = cfg["N"], cfg["Cin"], cfg["Cout"]
        H, W, ksize, pad = cfg["H"], cfg["W"], cfg["k"], cfg["pad"]

        weight = jax.random.normal(kw, (Cout, Cin, ksize, ksize), dtype=jnp.float32)
        bias = jnp.zeros((Cout,), jnp.float32)
        multiplier = math.sqrt(2.0 / (Cin * ksize * ksize))
        x = jax.random.normal(kx, (N, Cin, H, W), dtype=jnp.float32)   # NCHW like PyTorch

        out = jax.block_until_ready(
            fds(x, weight, bias, multiplier, pad=pad,
                max_cout_tile=cfg.get("max_cout_tile"),
                max_rows_tile=cfg.get("max_rows_tile")))

        ref = fused_downsample_ref(x, weight, bias, multiplier, pad)
        assert out.shape == ref.shape, (i, out.shape, ref.shape)
        max_err = float(jnp.max(jnp.abs(out - ref)))
        # bf16 inputs with f32 accumulation -> looser tolerance than pure f32.
        assert jnp.allclose(out, ref, atol=5e-2, rtol=5e-2), (i, max_err)

    print("KERNEL_OK")
</pallas_src>

<mosaic_0001>
module attributes {stable_mosaic.version = 11 : i64} {
  func.func @_fds_kernel_slab(%arg0: i32, %arg1: i32, %arg2: i32, %arg3: memref<1x1x16x144xbf16, #tpu.memory_space<vmem>>, %arg4: memref<8x64xbf16, #tpu.memory_space<vmem>>, %arg5: memref<8x1xf32, #tpu.memory_space<vmem>>, %arg6: memref<1x1x8x128xf32, #tpu.memory_space<vmem>>, %arg7: memref<64x128xbf16, #tpu.memory_space<vmem>>) attributes {dimension_semantics = [#tpu.dimension_semantics<parallel>, #tpu.dimension_semantics<parallel>, #tpu.dimension_semantics<arbitrary>], iteration_bounds = array<i64: 2, 1, 1>, scalar_prefetch = 0 : i64, scratch_operands = 1 : i64, tpu.core_type = #tpu.core_type<tc>, window_params = [{transform_indices = @transform_0, window_bounds = array<i64: 1, 1, 16, 144>}, {transform_indices = @transform_1, window_bounds = array<i64: 8, 64>}, {transform_indices = @transform_2, window_bounds = array<i64: 8, 1>}, {transform_indices = @transform_3, window_bounds = array<i64: 1, 1, 8, 128>}]} {
    %c0_i32 = arith.constant 0 : i32
    %0 = arith.cmpi eq, %arg2, %c0_i32 : i32
    %1 = arith.extui %0 : i1 to i32
    %c0_i32_0 = arith.constant 0 : i32
    %2 = arith.cmpi ne, %1, %c0_i32_0 : i32
    scf.if %2 {
      %c0_10 = arith.constant 0 : index
      %c0_11 = arith.constant 0 : index
      %c0_12 = arith.constant 0 : index
      %c0_13 = arith.constant 0 : index
      %12 = vector.load %arg3[%c0_10, %c0_11, %c0_12, %c0_13] : memref<1x1x16x144xbf16, #tpu.memory_space<vmem>>, vector<1x1x16x144xbf16>
      %13 = vector.shape_cast %12 : vector<1x1x16x144xbf16> to vector<16x144xbf16>
      %14 = vector.extract_strided_slice %13 {offsets = [0, 0], sizes = [16, 128], strides = [1, 1]} : vector<16x144xbf16> to vector<16x128xbf16>
      %c0_14 = arith.constant 0 : index
      %c0_15 = arith.constant 0 : index
      %15 = vector.load %arg7[%c0_14, %c0_15] : memref<64x128xbf16, #tpu.memory_space<vmem>>, vector<16x128xbf16>
      tpu.vector_store %arg7[%c0_14, %c0_15], %14 {strides = array<i32>} : memref<64x128xbf16, #tpu.memory_space<vmem>>, vector<16x128xbf16>,
      %16 = vector.extract_strided_slice %13 {offsets = [0, 1], sizes = [16, 128], strides = [1, 1]} : vector<16x144xbf16> to vector<16x128xbf16>
      %c16 = arith.constant 16 : index
      %c0_16 = arith.constant 0 : index
      %17 = vector.load %arg7[%c16, %c0_16] : memref<64x128xbf16, #tpu.memory_space<vmem>>, vector<16x128xbf16>
      tpu.vector_store %arg7[%c16, %c0_16], %16 {strides = array<i32>} : memref<64x128xbf16, #tpu.memory_space<vmem>>, vector<16x128xbf16>,
      %18 = vector.extract_strided_slice %13 {offsets = [0, 9], sizes = [16, 128], strides = [1, 1]} : vector<16x144xbf16> to vector<16x128xbf16>
      %c32 = arith.constant 32 : index
      %c0_17 = arith.constant 0 : index
      %19 = vector.load %arg7[%c32, %c0_17] : memref<64x128xbf16, #tpu.memory_space<vmem>>, vector<16x128xbf16>
      tpu.vector_store %arg7[%c32, %c0_17], %18 {strides = array<i32>} : memref<64x128xbf16, #tpu.memory_space<vmem>>, vector<16x128xbf16>,
      %20 = vector.extract_strided_slice %13 {offsets = [0, 10], sizes = [16, 128], strides = [1, 1]} : vector<16x144xbf16> to vector<16x128xbf16>
      %c48 = arith.constant 48 : index
      %c0_18 = arith.constant 0 : index
      %21 = vector.load %arg7[%c48, %c0_18] : memref<64x128xbf16, #tpu.memory_space<vmem>>, vector<16x128xbf16>
      tpu.vector_store %arg7[%c48, %c0_18], %20 {strides = array<i32>} : memref<64x128xbf16, #tpu.memory_space<vmem>>, vector<16x128xbf16>,
    } else {
    }
    %c0 = arith.constant 0 : index
    %c0_1 = arith.constant 0 : index
    %3 = vector.load %arg4[%c0, %c0_1] : memref<8x64xbf16, #tpu.memory_space<vmem>>, vector<8x64xbf16>
    %c0_2 = arith.constant 0 : index
    %c0_3 = arith.constant 0 : index
    %4 = vector.load %arg7[%c0_2, %c0_3] : memref<64x128xbf16, #tpu.memory_space<vmem>>, vector<64x128xbf16>
    %cst = arith.constant dense<0.000000e+00> : vector<8x128xf32>
    %5 = tpu.matmul %3, %4, %cst {dimension_numbers = #tpu.dot_dimension_numbers<[1], [0], [0], [1], [0, 0, 1, 1], [], []>} : vector<8x64xbf16>, vector<64x128xbf16>, vector<8x128xf32> -> vector<8x128xf32>
    %c0_4 = arith.constant 0 : index
    %c0_5 = arith.constant 0 : index
    %6 = vector.load %arg5[%c0_4, %c0_5] : memref<8x1xf32, #tpu.memory_space<vmem>>, vector<8x1xf32>
    %7 = vector.broadcast %6 : vector<8x1xf32> to vector<8x128xf32>
    %8 = arith.addf %5, %7 : vector<8x128xf32>
    %c0_6 = arith.constant 0 : index
    %c0_7 = arith.constant 0 : index
    %c0_8 = arith.constant 0 : index
    %c0_9 = arith.constant 0 : index
    %9 = vector.load %arg6[%c0_6, %c0_7, %c0_8, %c0_9] : memref<1x1x8x128xf32, #tpu.memory_space<vmem>>, vector<1x1x8x128xf32>
    %10 = vector.shape_cast %9 : vector<1x1x8x128xf32> to vector<8x128xf32>
    %11 = vector.shape_cast %8 : vector<8x128xf32> to vector<1x1x8x128xf32>
    tpu.vector_store %arg6[%c0_6, %c0_7, %c0_8, %c0_9], %11 {strides = array<i32>} : memref<1x1x8x128xf32, #tpu.memory_space<vmem>>, vector<1x1x8x128xf32>,
    return
  }
  func.func @transform_0(%arg0: i32, %arg1: i32, %arg2: i32) -> (i32, i32, i32, i32) {
    %c0_i32 = arith.constant 0 : i32
    %c0_i32_0 = arith.constant 0 : i32
    %c0_i32_1 = arith.constant 0 : i32
    return %arg0, %arg1, %c0_i32, %c0_i32_0 : i32, i32, i32, i32
  }
  func.func @transform_1(%arg0: i32, %arg1: i32, %arg2: i32) -> (i32, i32) {
    %c0_i32 = arith.constant 0 : i32
    %c0_i32_0 = arith.constant 0 : i32
    return %arg2, %c0_i32 : i32, i32
  }
  func.func @transform_2(%arg0: i32, %arg1: i32, %arg2: i32) -> (i32, i32) {
    %c0_i32 = arith.constant 0 : i32
    %c0_i32_0 = arith.constant 0 : i32
    return %arg2, %c0_i32 : i32, i32
  }
  func.func @transform_3(%arg0: i32, %arg1: i32, %arg2: i32) -> (i32, i32, i32, i32) {
    %c0_i32 = arith.constant 0 : i32
    %c0_i32_0 = arith.constant 0 : i32
    return %arg0, %arg1, %arg2, %c0_i32 : i32, i32, i32, i32
  }
}

</mosaic_0001>

<bundles_post_ra>
// kernel: fused_downsample.1
= control target key start
LH: loop header
LB: loop body
LE: loop exit
PB: predicated region body
PF: predicated region fallthrough
CT: control target
= control target key end

     0   :  { %s594_s12 = smov 0   ;;  %s596_s13 = smov 0   ;;  %s641_s0 = inlined_call_operand.vmem [shape: bf16[2,1,16,144], index: 0, kind: input, shape index: {}]   ;;  %s642_s1 = inlined_call_operand.vmem [shape: bf16[8,64], index: 1, kind: input, shape index: {}]   ;;  %s643_s2 = inlined_call_operand.vmem [shape: f32[8,1], index: 2, kind: input, shape index: {}]   ;;  %s644_s3 = inlined_call_operand.vmem [shape: f32[2,1,8,128], index: 3, kind: output, shape index: {}]  }
   0x1   :  { %s598_s14 = smov 0  }
   0x2 LB: > { %s32_s15 = sadd.s32 1, %s564_s13  ;;  %p489_p0 = scmp.ge.s32.totalorder %s568_s14, 1  ;;  %s568_s14 = sphi %s598_s14, %s13_s14   ;;  %s564_s13 = sphi %s596_s13, %s646_s13   ;;  %s560_s12 = sphi %s594_s12, %s645_s12  }
   0x3   : > { %p34_p1 = scmp.ge.s32.totalorder %s32_s15, 2  ;;  %p184_p2 = scmp.lt.s32.totalorder %s568_s14, 3 }
   0x5   : > { %s648_s15 = smov (%p34_p1, %s32_s15), 0  ;;  %p185_p3 = pnand %p489_p0, %p184_p2 }
   0x6   : > { %p225_p4 = scmp.lt.s32.totalorder (!%p185_p3), %s560_s12, 1  ;;  %s570_s20 = smov (!%p185_p3), 119  }
   0x7   : > { %188 = sbr.rel (%p185_p3) target bundleno = 300 (0x12c), region = 32  ;;  %s571_s21 = smov (!%p185_p3), 118  }
   0x8   : > { %s572_s22 = smov (!%p185_p3), 127  }
   0xc   : > { %s650_s12 = smov (!%p225_p4, %s560_s12), 1  ;;  %vm269_vm0 = vcmask 1039360   ;;  %vm282_vm1 = vcmask 973824   ;;  %vm295_vm2 = vcmask 965632   ;;  %v311_v14 = vld [vmem:[%s643_s2] sm:$0xff]  ;;  %v573_v15 = vmov 0  }
   0xd   : > { %s512_s16 = sshll.u32 %s650_s12, 4  ;;  %545 = vset.pattern.permute.xlu0 %v573_v15  ;;  %v302_v26 = vld [vmem:[%s642_s1] sm:$0xf]  ;;  %vm341_vm3 = vcmask 523264   ;;  %s492_s27 = sshll.u32 %s650_s12, 3 }
   0xe   : > { %s233_s19 = scalar_lea.vmem %s641_s0, %s512_s16  ;;  %s251_s30 = scalar_lea.vmem %s644_s3, %s492_s27 }
   0xf   : > { %v257_v0 = vld [vmem:[%s233_s19] sm:$0xff]  ;;  %v258_v1 = vld [vmem:[%s233_s19 + $0x8] sm:$0xff] }
  0x10   : > { %276 = vrot.lane.b32.xlu1 %v257_v0, %s570_s20  ;;  %259 = vst [vmem:[#allocation2] sm:$0xf] %v257_v0  ;;  %289 = vrot.lane.b32.xlu0 %v257_v0, %s571_s21 }
  0x11   : > { %260 = vst [vmem:[#allocation2 + $0x4] sm:$0xf] %v258_v1  ;;  %263 = vrot.lane.b32.xlu2 %v257_v0, %s572_s22 }
  0x18   : > { %278 = vrot.lane.b32.xlu1 %v258_v1, %s570_s20  ;;  %291 = vrot.lane.b32.xlu0 %v258_v1, %s571_s21  ;;  %v513_v25 = vld [vmem:[#allocation2] sm:$0xff] }
  0x19   : > { %265 = vrot.lane.b32.xlu2 %v258_v1, %s572_s22 }
  0x20   : > { %314 = vperm.xlu0 %545, %v311_v14  }
  0x6b   : > { %v264_v2 = vpop.permute.xlu2 %263 }
  0x6c   : > { %v267_v3 = vrot.slane %v264_v2, 4 }
  0x6e   : > { %v270_v4 = vsel %vm269_vm0, %v264_v2, %v267_v3 }
  0x6f   : > { %274 = vst [vmem:[#allocation2 + $0x8] sm:$0xf] %v270_v4 }
  0x73   : > { %v266_v5 = vpop.permute.xlu2 %265 }
  0x74   : > { %v268_v6 = vrot.slane %v266_v5, 4 }
  0x76   : > { %v271_v7 = vsel %vm269_vm0, %v266_v5, %v268_v6 }
  0x77   : > { %275 = vst [vmem:[#allocation2 + $0xc] sm:$0xf] %v271_v7 }
  0x7e   : > { %v514_v24 = vld [vmem:[#allocation2 + $0x8] sm:$0xff] }
  0x82   : > { %v277_v8 = vpop.permute.xlu1 %276  ;;  %v290_v9 = vpop.permute.xlu0 %289 }
  0x83   : > { %v280_v10 = vrot.slane %v277_v8, 4  ;;  %v293_v11 = vrot.slane %v290_v9, 4 }
  0x85   : > { %v283_v12 = vsel %vm282_vm1, %v277_v8, %v280_v10  ;;  %v296_v13 = vsel %vm295_vm2, %v290_v9, %v293_v11 }
  0x86   : > { %287 = vst [vmem:[#allocation2 + $0x10] sm:$0xf] %v283_v12 }
  0x87   : > { %300 = vst [vmem:[#allocation2 + $0x18] sm:$0xf] %v296_v13 }
  0x8a   : > { %v279_v16 = vpop.permute.xlu1 %278  ;;  %v292_v17 = vpop.permute.xlu0 %291 }
  0x8b   : > { %v281_v18 = vrot.slane %v279_v16, 4  ;;  %v294_v19 = vrot.slane %v292_v17, 4 }
  0x8d   : > { %v284_v20 = vsel %vm282_vm1, %v279_v16, %v281_v18  ;;  %v297_v21 = vsel %vm295_vm2, %v292_v17, %v294_v19 }
  0x8e   : > { %288 = vst [vmem:[#allocation2 + $0x14] sm:$0xf] %v284_v20 }
  0x8f   : > { %301 = vst [vmem:[#allocation2 + $0x1c] sm:$0xf] %v297_v21 }
  0x92   : > { %v315_v27 = vpop.permute.xlu0 %314 }
  0x95   : > { %v515_v23 = vld [vmem:[#allocation2 + $0x10] sm:$0xff] }
  0x96   : > { %v516_v22 = vld [vmem:[#allocation2 + $0x18] sm:$0xff] }
  0x97   : > { %349 = vmatpush.bf16.msra.mxu0 %v516_v22 }
  0x9b   : > { %350 = vmatpush.bf16.msra.mxu0 %v515_v23 }
  0x9f   : > { %351 = vmatpush.bf16.msra.mxu0 %v514_v24 }
  0xa3   : > { %352 = vmatpush.bf16.msra.mxu0 %v513_v25 }
  0xa6   : > { %509 = vmatmul.msk.bf16.vlgmr.msra.gmra.mxu0 %vm341_vm3, %v302_v26 }
 0x123   : > { %v354_v28 = vpop.f32.mrf.mxu0 }
 0x124   : > { %v355_v29 = vadd.f32 %v354_v28, %v315_v27 }
 0x126   : > { %358 = vst [vmem:[%s251_s30] sm:$0xff] %v355_v29 }
 0x12b   : > { %v356_v30 = vpop.f32.mrf.mxu0 }
 0x12c PF: > { %s13_s14 = sadd.s32 1, %s568_s14   ;;  %s645_s12 = smov %s564_s13 }
 0x12d   : > { %p10_p5 = scmp.ge.s32.totalorder %s13_s14, 4   ;;  %s646_s13 = smov %s648_s15 }
 0x12f   :  { %12 = sbr.rel (!%p10_p5) target bundleno = 2 (0x2), region = 72 }

</bundles_post_ra>
